<compile_context>
chip_gen: v7x
topology: tpu7x:2x2x1
jax: 0.10.0
libtpu: 0.0.40
codegen_flags: <defaults>
</compile_context>

<pallas_src>
import jax
import jax.numpy as jnp
from jax import lax
from jax.experimental import pallas as pl
from jax.experimental.pallas import tpu as pltpu


def _gumbel_argmax_kernel(logp_ref, gumbel_ref, out_ref):
    # logp_ref   : VMEM (Bt, C) float32  -- log-probabilities (need not be normalized)
    # gumbel_ref : VMEM (Bt, C) float32  -- standard Gumbel(0, 1) noise
    # out_ref    : VMEM (Bt, 1) int32    -- sampled class index per row
    x = logp_ref[...].astype(jnp.float32) + gumbel_ref[...]        # (Bt, C) VPU add
    c = x.shape[-1]
    m = jnp.max(x, axis=-1, keepdims=True)                         # XLU lane reduce
    lane = lax.broadcasted_iota(jnp.int32, x.shape, 1)             # class index per lane
    # First index attaining the max (ties are measure-zero with Gumbel noise).
    idx = jnp.min(jnp.where(x >= m, lane, jnp.int32(c)),
                  axis=-1, keepdims=True)
    out_ref[...] = idx
    # TODO(synk): output is (Bt, 1) (lane width 1); a lane-dense (1, Bt) slab
    # would avoid masked vst stores, but the output is tiny here.


def categorical_sample(log_p, key, *, block_b: int = 256):
    """Pallas equivalent of torch.multinomial(log_p.exp(), 1).long().squeeze(1).

    Uses the Gumbel-max trick: argmax_j (log_p[j] + G_j), G_j ~ Gumbel(0,1),
    which samples class j with probability exp(log_p[j]) / sum_k exp(log_p[k]).
    """
    B, C = log_p.shape
    log_p = log_p.astype(jnp.float32)
    gumbel = jax.random.gumbel(key, (B, C), dtype=jnp.float32)

    # Batch tile: multiple of 8 (sublane) when we actually tile; otherwise the
    # whole (small) batch is one block (full-dim blocks bypass the (8,128) rule).
    if B <= block_b:
        bt = B
        bp = B
    else:
        bt = block_b  # multiple of 8
        bp = pl.cdiv(B, bt) * bt
        if bp != B:
            pad = bp - B
            log_p = jnp.pad(log_p, ((0, pad), (0, 0)))
            gumbel = jnp.pad(gumbel, ((0, pad), (0, 0)))

    grid = (bp // bt,)
    out = pl.pallas_call(
        _gumbel_argmax_kernel,
        out_shape=jax.ShapeDtypeStruct((bp, 1), jnp.int32),
        grid_spec=pltpu.PrefetchScalarGridSpec(
            num_scalar_prefetch=0,
            grid=grid,
            in_specs=[
                pl.BlockSpec((bt, C), lambda i: (i, 0)),   # log_p tile
                pl.BlockSpec((bt, C), lambda i: (i, 0)),   # gumbel tile
            ],
            out_specs=pl.BlockSpec((bt, 1), lambda i: (i, 0)),
        ),
        compiler_params=pltpu.CompilerParams(
            dimension_semantics=("parallel",),
            vmem_limit_bytes=64 * 1024 * 1024,
        ),
    )(log_p, gumbel)

    # torch returns int64 (.long()); JAX without x64 keeps int32 — documented.
    return out[:B, 0]


if __name__ == "__main__":
    key = jax.random.PRNGKey(0)
    k_logits, k_sample = jax.random.split(key)

    B, C = 2, 32  # batch of 2 rows of a 32-way categorical
    logits = jax.random.normal(k_logits, (B, C), dtype=jnp.float32)
    log_p = jax.nn.log_softmax(logits, axis=-1)   # proper log-probs

    samples = categorical_sample(log_p, k_sample)
    samples = jax.block_until_ready(samples)

    assert samples.shape == (B,), samples.shape
    assert bool(jnp.all((samples >= 0) & (samples < C)))
    print("KERNEL_OK")
</pallas_src>

<mosaic_0001>
module attributes {stable_mosaic.version = 11 : i64} {
  func.func @_gumbel_argmax_kernel(%arg0: i32, %arg1: memref<2x32xf32, #tpu.memory_space<vmem>>, %arg2: memref<2x32xf32, #tpu.memory_space<vmem>>, %arg3: memref<2x1xi32, #tpu.memory_space<vmem>>) attributes {dimension_semantics = [#tpu.dimension_semantics<parallel>], iteration_bounds = array<i64: 1>, scalar_prefetch = 0 : i64, scratch_operands = 0 : i64, tpu.core_type = #tpu.core_type<tc>, window_params = [{transform_indices = @transform_0, window_bounds = array<i64: 2, 32>}, {transform_indices = @transform_1, window_bounds = array<i64: 2, 32>}, {transform_indices = @transform_2, window_bounds = array<i64: 2, 1>}]} {
    %c0 = arith.constant 0 : index
    %c0_0 = arith.constant 0 : index
    %0 = vector.load %arg1[%c0, %c0_0] : memref<2x32xf32, #tpu.memory_space<vmem>>, vector<2x32xf32>
    %c0_1 = arith.constant 0 : index
    %c0_2 = arith.constant 0 : index
    %1 = vector.load %arg2[%c0_1, %c0_2] : memref<2x32xf32, #tpu.memory_space<vmem>>, vector<2x32xf32>
    %2 = arith.addf %0, %1 : vector<2x32xf32>
    %cst = arith.constant dense<0xFF800000> : vector<2xf32>
    %3 = vector.multi_reduction <maximumf>, %2, %cst [1] : vector<2x32xf32> to vector<2xf32>
    %4 = vector.shape_cast %3 : vector<2xf32> to vector<2x1xf32>
    %5 = tpu.iota {dimensions = array<i32: 1>} : vector<2x32xi32>
    %6 = vector.broadcast %4 : vector<2x1xf32> to vector<2x32xf32>
    %7 = arith.cmpf oge, %2, %6 : vector<2x32xf32>
    %c32_i32 = arith.constant 32 : i32
    %8 = vector.broadcast %c32_i32 : i32 to vector<2x32xi32>
    %9 = arith.select %7, %5, %8 : vector<2x32xi1>, vector<2x32xi32>
    %cst_3 = arith.constant dense<2147483647> : vector<2xi32>
    %10 = vector.multi_reduction <minsi>, %9, %cst_3 [1] : vector<2x32xi32> to vector<2xi32>
    %11 = vector.shape_cast %10 : vector<2xi32> to vector<2x1xi32>
    %c0_4 = arith.constant 0 : index
    %c0_5 = arith.constant 0 : index
    %12 = vector.load %arg3[%c0_4, %c0_5] : memref<2x1xi32, #tpu.memory_space<vmem>>, vector<2x1xi32>
    tpu.vector_store %arg3[%c0_4, %c0_5], %11 {strides = array<i32>} : memref<2x1xi32, #tpu.memory_space<vmem>>, vector<2x1xi32>,
    return
  }
  func.func @transform_0(%arg0: i32) -> (i32, i32) {
    %c0_i32 = arith.constant 0 : i32
    %c0_i32_0 = arith.constant 0 : i32
    return %arg0, %c0_i32 : i32, i32
  }
  func.func @transform_1(%arg0: i32) -> (i32, i32) {
    %c0_i32 = arith.constant 0 : i32
    %c0_i32_0 = arith.constant 0 : i32
    return %arg0, %c0_i32 : i32, i32
  }
  func.func @transform_2(%arg0: i32) -> (i32, i32) {
    %c0_i32 = arith.constant 0 : i32
    %c0_i32_0 = arith.constant 0 : i32
    return %arg0, %c0_i32 : i32, i32
  }
}

</mosaic_0001>

<bundles_post_ra>
// kernel: tpu_custom_call.1
= control target key start
LH: loop header
LB: loop body
LE: loop exit
PB: predicated region body
PF: predicated region fallthrough
CT: control target
= control target key end

     0   :  { %7 = vsyncpa [#allocation3], 0  ;;  %s209_s0 = inlined_call_operand.hbm [shape: f32[2,32], index: 0, kind: input, shape index: {}]   ;;  %s210_s1 = inlined_call_operand.hbm [shape: f32[2,32], index: 1, kind: input, shape index: {}]   ;;  %s211_s2 = inlined_call_operand.hbm [shape: s32[2,1], index: 2, kind: output, shape index: {}]  }
   0x1   :  { %8 = vsyncpa [#allocation6], 0 }
   0x2   :  { %9 = vsyncpa [#allocation4], 0  ;;  %s155_s9 = smov [#allocation2]   ;;  %s156_s11 = smov [#allocation5]  }
   0x3   :  { %s16_s10 = sshll.u32 %s155_s9, 4  ;;  %s26_s12 = sshll.u32 %s156_s11, 4  ;;  %s17_s10 = int_to_ptr.vmem [resolvable:$true] %s16_s10  ;;  %s27_s12 = int_to_ptr.vmem [resolvable:$true] %s26_s12 }
   0x4   :  { %s83_s15 = scalar_lea.hbm %s209_s0, 32 }
   0x5   :  { %p84_p0 = scmp.ne.s32.totalorder %s209_s0, %s83_s15  ;;  %p87_p1 = scmp.lt.u32.totalorder %s83_s15, %s209_s0 }
   0x7   :  { %p89_p2 = pnand %p87_p1, %p84_p0 }
   0x9   :  { %92 = shalt.err (!%p89_p2)
}
   0xa   :  { %s93_s20 = scalar_lea.vmem %s17_s10, 32  ;;  %p98_p4 = scmp.lt.s32.totalorder %s17_s10, %s17_s10 }
   0xb   :  { %p94_p3 = scmp.ne.s32.totalorder %s17_s10, %s93_s20  ;;  %p99_p5 = scmp.lt.s32.totalorder %s93_s20, %s93_s20 }
   0xd   :  { %p100_p6 = por %p99_p5, %p98_p4 }
   0xf   :  { %p101_p7 = pnand %p100_p6, %p94_p3 }
  0x11   :  { %104 = shalt.err (!%p101_p7)
}
  0x12   :  { %19 = dma.hbm_to_vmem [thread:$0]  %s209_s0, 32, %s17_s10, [#allocation3]  }
  0x13   :  { %s105_s25 = scalar_lea.hbm %s210_s1, 32 }
  0x14   :  { %p106_p8 = scmp.ne.s32.totalorder %s210_s1, %s105_s25  ;;  %p109_p9 = scmp.lt.u32.totalorder %s105_s25, %s210_s1 }
  0x16   :  { %p111_p10 = pnand %p109_p9, %p106_p8 }
  0x18   :  { %114 = shalt.err (!%p111_p10)
}
  0x19   :  { %s115_s30 = scalar_lea.vmem %s27_s12, 32  ;;  %p120_p12 = scmp.lt.s32.totalorder %s27_s12, %s27_s12 }
  0x1a   :  { %p116_p11 = scmp.ne.s32.totalorder %s27_s12, %s115_s30  ;;  %p121_p13 = scmp.lt.s32.totalorder %s115_s30, %s115_s30 }
  0x1c   :  { %p122_p0 = por %p121_p13, %p120_p12 }
  0x1e   :  { %p123_p1 = pnand %p122_p0, %p116_p11 }
  0x20   :  { %126 = shalt.err (!%p123_p1)
}
  0x21   :  { %29 = dma.hbm_to_vmem [thread:$0]  %s210_s1, 32, %s27_s12, [#allocation6]  }
  0x22   :  { %149 = dma.done.wait [#allocation3], 32  }
  0x23   :  { %150 = vsyncadd [#allocation3], 4294967264 }
  0x24   :  { %151 = dma.done.wait [#allocation6], 32  }
  0x25   :  { %152 = vsyncadd [#allocation6], 4294967264  ;;  %v36_v0 = vld [vmem:[#allocation2] sm:$0x3]  ;;  %v37_v1 = vld [vmem:[#allocation5] sm:$0x3]  ;;  %v43_v4 = vlaneseq }
  0x26   :  { %vm39_vm0 = vcmask 254976   ;;  %v38_v2 = vadd.f32 %v37_v1, %v36_v0  ;;  %s157_s1 = smov [#allocation7]   ;;  %vm62_vm3 = vcmask 1024  }
  0x27   :  { %v44_v5 = vand.u32 127, %v43_v4  ;;  %s70_s4 = sshll.u32 %s157_s1, 4  ;;  %s71_s4 = int_to_ptr.vmem [resolvable:$true] %s70_s4 }
  0x28   :  { %v40_v3 = vsel %vm39_vm0, %v38_v2, -inf  ;;  %s127_s5 = scalar_lea.vmem %s71_s4, 32  ;;  %p132_p3 = scmp.lt.s32.totalorder %s71_s4, %s71_s4 }
  0x29   :  { %41 = vmax.xlane.f32.xlu0 %v40_v3  ;;  %p128_p2 = scmp.ne.s32.totalorder %s71_s4, %s127_s5  ;;  %p133_p4 = scmp.lt.s32.totalorder %s127_s5, %s127_s5 }
  0x2b   :  { %p134_p5 = por %p133_p4, %p132_p3 }
  0x2d   :  { %p135_p6 = pnand %p134_p5, %p128_p2 }
  0xb6   :  { %v42_v6 = vpop.xlane.xlu0 %41 }
  0xb7   :  { %vm45_vm1 = vcmp.ge.f32.partialorder %v38_v2, %v42_v6 }
  0xb8   :  { %v46_v7 = vsel %vm45_vm1, %v44_v5, 32 }
  0xb9   :  { %v47_v8 = vsel %vm39_vm0, %v46_v7, 2147483647 }
  0xba   :  { %v49_v9 = vshra.s32 %v47_v8, 16  ;;  %v48_v11 = vand.u32 65535, %v47_v8 }
  0xbc   :  { %v51_v10 = vcvt.s32.f32 %v49_v9  ;;  %v50_v13 = vcvt.s32.f32 %v48_v11 }
  0xbe   :  { %52 = vmin.xlane.f32.xlu0 %v51_v10 }
 0x14b   :  { %v53_v12 = vpop.xlane.xlu0 %52 }
 0x14c   :  { %vm54_vm2 = vcmp.eq.f32.partialorder %v51_v10, %v53_v12  ;;  %v59_v15 = vcvt.f32.s32 %v53_v12 }
 0x14d   :  { %v55_v14 = vsel %vm54_vm2, %v50_v13, inf }
 0x14e   :  { %56 = vmin.xlane.f32.xlu1 %v55_v14  ;;  %v60_v17 = vshll.u32 %v59_v15, 16 }
 0x1db   :  { %v57_v16 = vpop.xlane.xlu1 %56 }
 0x1dc   :  { %v58_v18 = vcvt.f32.s32 %v57_v16 }
 0x1de   :  { %v61_v19 = vadd.s32 %v60_v17, %v58_v18 }
 0x1e0   :  { %63 = vst.msk [vmem:[#allocation7] sm:$0x3] %vm62_vm3, %v61_v19 }
 0x1e1   :  { %138 = shalt.err (!%p135_p6)
}
 0x1e2   :  { %s139_s8 = scalar_lea.hbm %s211_s2, 32 }
 0x1e3   :  { %p140_p7 = scmp.ne.s32.totalorder %s211_s2, %s139_s8  ;;  %p143_p8 = scmp.lt.u32.totalorder %s139_s8, %s211_s2 }
 0x1e5   :  { %p145_p9 = pnand %p143_p8, %p140_p7 }
 0x1e7   :  { %148 = shalt.err (!%p145_p9)
}
 0x1e8   :  { %73 = dma.vmem_to_hbm [thread:$0]  %s71_s4, 32, %s211_s2, [#allocation4]  }
 0x1e9   :  { %153 = dma.done.wait [#allocation4], 32  }
 0x1ea   :  { %154 = vsyncadd [#allocation4], 4294967264 }
 0x1eb   :  { %77 = vsyncpa [#allocation3], 1 }
 0x1ec   :  { %78 = vsyncpa [#allocation6], 1 }
 0x1ed   :  { %79 = vsyncpa [#allocation4], 1 }

</bundles_post_ra>
